<compile_context>
chip_gen: v5e
topology: v5e:2x2
jax: 0.10.0
libtpu: 0.0.40
codegen_flags: <defaults>
</compile_context>

<pallas_src>
import jax
import jax.numpy as jnp
from jax import lax
from jax.experimental import pallas as pl
from jax.experimental.pallas import tpu as pltpu


def _round_up(x, m):
    return (x + m - 1) // m * m


def _clip_adapter_single_step_kernel(img_ref, wvis_ref, bvis_ref, txt_ref, out_ref):
    # Whole problem fits in VMEM in one shot: no reduction axis, no scratch.
    feat = jnp.dot(img_ref[...], wvis_ref[...],
                   preferred_element_type=jnp.float32) + bvis_ref[...]      # [B, D] f32
    sq = jnp.sum(feat * feat, axis=-1, keepdims=True)                       # [B, 1]
    # normalize_feature + temperature folded into one post-matmul row scale.
    scale = jnp.where(sq > 0.0, 100.0 * lax.rsqrt(sq), 0.0)                 # EUP rsqrt
    # get_sim_logits: bf16 x bf16 MXU matmul with f32 accumulation (deliberate cast).
    raw = jnp.dot(feat.astype(jnp.bfloat16), txt_ref[...],
                  preferred_element_type=jnp.float32)                       # [B, T_pad]
    out_ref[...] = (raw * scale).astype(out_ref.dtype)


def _clip_adapter_reduce_kernel(img_ref, wvis_ref, bvis_ref, txt_ref, out_ref, acc_ref):
    k = pl.program_id(0)

    @pl.when(k == 0)
    def _():
        acc_ref[...] = jnp.zeros_like(acc_ref)

    # --- clip_model.visual(image): partial matmul over this K tile (bf16 -> f32 acc) ---
    acc_ref[...] += jnp.dot(img_ref[...], wvis_ref[...],
                            preferred_element_type=jnp.float32)             # [B, D] f32

    @pl.when(k == pl.num_programs(0) - 1)
    def _():
        feat = acc_ref[...] + bvis_ref[...]                                 # [B, D] f32
        sq = jnp.sum(feat * feat, axis=-1, keepdims=True)                   # [B, 1]
        scale = jnp.where(sq > 0.0, 100.0 * lax.rsqrt(sq), 0.0)
        raw = jnp.dot(feat.astype(jnp.bfloat16), txt_ref[...],
                      preferred_element_type=jnp.float32)                   # [B, T_pad]
        out_ref[...] = (raw * scale).astype(out_ref.dtype)


def clip_adapter_forward(image_nchw, w_visual, b_visual, text_features):
    """image_nchw: [B, C, H, W]; w_visual: [C*H*W, D]; b_visual: [D];
    text_features: [T, D] (already produced by the prompt learner, L2-normalized)."""
    B, C, H, W = image_nchw.shape
    K, D = w_visual.shape
    T, Dt = text_features.shape
    assert K == C * H * W and Dt == D

    # ---- wrapper-side layout plumbing (pad to packed / lane-dense shapes) ----
    B_pad = _round_up(max(B, 16), 16)       # bf16 packs 16 rows per sublane group
    D_pad = _round_up(max(D, 128), 128)     # lane-dense weight / acc / bias / txt
    T_pad = _round_up(max(T, 128), 128)     # lane-dense output (no masked partial stores)

    # K tile: 1024 for large K (safe inside v7x's 64 MiB; v6e/v5e could go 2048),
    # otherwise a single tile -> single-step kernel with no reduction machinery.
    if K <= 1024:
        K_pad = _round_up(max(K, 128), 128)
        tk = K_pad
    else:
        tk = 1024
        K_pad = _round_up(K, tk)
    nk = K_pad // tk

    img = image_nchw.reshape(B, K).astype(jnp.bfloat16)
    img = jnp.pad(img, ((0, B_pad - B), (0, K_pad - K)))                    # [B_pad, K_pad] bf16
    w_bf = jnp.pad(w_visual.astype(jnp.bfloat16),
                   ((0, K_pad - K), (0, D_pad - D)))                        # [K_pad, D_pad] bf16
    bias = jnp.pad(b_visual.astype(jnp.float32).reshape(1, D),
                   ((0, 0), (0, D_pad - D)))                                # [1, D_pad]    f32
    txt_t = jnp.pad(text_features.T.astype(jnp.bfloat16),
                    ((0, D_pad - D), (0, T_pad - T)))                       # [D_pad, T_pad] bf16

    cost = pl.CostEstimate(
        flops=2 * B_pad * K_pad * D_pad + 2 * B_pad * D_pad * T_pad,
        transcendentals=B_pad,
        bytes_accessed=(img.size * 2 + w_bf.size * 2 + bias.size * 4
                        + txt_t.size * 2 + B_pad * T_pad * 4),
    )

    if nk == 1:
        # Toy / small-K fast path: everything resident in VMEM, zero pipeline overhead.
        out = pl.pallas_call(
            _clip_adapter_single_step_kernel,
            out_shape=jax.ShapeDtypeStruct((B_pad, T_pad), jnp.float32),
            compiler_params=pltpu.CompilerParams(
                vmem_limit_bytes=64 * 1024 * 1024),
            cost_estimate=cost,
        )(img, w_bf, bias, txt_t)
    else:
        out = pl.pallas_call(
            _clip_adapter_reduce_kernel,
            out_shape=jax.ShapeDtypeStruct((B_pad, T_pad), jnp.float32),
            grid_spec=pltpu.PrefetchScalarGridSpec(
                num_scalar_prefetch=0,
                grid=(nk,),                                      # K reduction only
                in_specs=[
                    pl.BlockSpec((B_pad, tk), lambda k: (0, k)),     # image tile
                    pl.BlockSpec((tk, D_pad), lambda k: (k, 0)),     # visual weight tile
                    pl.BlockSpec((1, D_pad), lambda k: (0, 0)),      # bias (constant)
                    pl.BlockSpec((D_pad, T_pad), lambda k: (0, 0)),  # text features^T (constant)
                ],
                out_specs=pl.BlockSpec((B_pad, T_pad), lambda k: (0, 0)),
                scratch_shapes=[pltpu.VMEM((B_pad, D_pad), jnp.float32)],  # f32 accumulator
            ),
            compiler_params=pltpu.CompilerParams(
                dimension_semantics=("arbitrary",),
                vmem_limit_bytes=64 * 1024 * 1024,
            ),
            cost_estimate=cost,
        )(img, w_bf, bias, txt_t)

    return out[:B, :T]


def _reference(image, w_visual, b_visual, text_features):
    # Plain-JAX reference mirroring the kernel's deliberate bf16 casts
    # (MXU-native inputs, f32 accumulation).
    Bref = image.shape[0]
    img_bf = image.reshape(Bref, -1).astype(jnp.bfloat16).astype(jnp.float32)
    w_bf = w_visual.astype(jnp.bfloat16).astype(jnp.float32)
    feat = img_bf @ w_bf + b_visual
    scale = 100.0 / jnp.linalg.norm(feat, axis=-1, keepdims=True)
    raw = (feat.astype(jnp.bfloat16).astype(jnp.float32)
           @ text_features.T.astype(jnp.bfloat16).astype(jnp.float32))
    return raw * scale


if __name__ == "__main__":
    # Small shapes implied by the forward: batch=2, channels=4, spatial=16x16,
    # embed_dim=32, num_text_classes=8.
    B, C, H, W = 2, 4, 16, 16
    D = 32          # CLIP embed dim (synthetic)
    T = 8           # number of class-name prompts

    key = jax.random.PRNGKey(0)
    k_img, k_w, k_b, k_txt = jax.random.split(key, 4)

    image = jax.random.normal(k_img, (B, C, H, W), dtype=jnp.float32)

    # Deterministic synthetic "clip_model.visual" parameters (linear encoder).
    w_visual = jax.random.normal(k_w, (C * H * W, D), dtype=jnp.float32) * 0.02
    b_visual = jax.random.normal(k_b, (D,), dtype=jnp.float32) * 0.02

    # Deterministic synthetic text features (as if returned by prompt_learner /
    # text_feature_buffer); CLIP text features are L2-normalized upstream.
    txt = jax.random.normal(k_txt, (T, D), dtype=jnp.float32)
    text_features = txt / jnp.linalg.norm(txt, axis=-1, keepdims=True)

    # Primary run (single-step fast path at these toy sizes).
    logits = clip_adapter_forward(image, w_visual, b_visual, text_features)
    logits = jax.block_until_ready(logits)
    ref = _reference(image, w_visual, b_visual, text_features)
    assert logits.shape == (B, T)
    assert jnp.allclose(logits, ref, atol=3e-2, rtol=3e-2), (
        float(jnp.max(jnp.abs(logits - ref))))

    # Also exercise the pipelined K-reduction path (K = 4096 -> 4 tiles of 1024).
    B2, C2, H2, W2 = 2, 16, 16, 16
    k2_img, k2_w = jax.random.split(jax.random.PRNGKey(1), 2)
    image2 = jax.random.normal(k2_img, (B2, C2, H2, W2), dtype=jnp.float32)
    w_visual2 = jax.random.normal(k2_w, (C2 * H2 * W2, D), dtype=jnp.float32) * 0.01
    logits2 = clip_adapter_forward(image2, w_visual2, b_visual, text_features)
    logits2 = jax.block_until_ready(logits2)
    ref2 = _reference(image2, w_visual2, b_visual, text_features)
    assert logits2.shape == (B2, T)
    assert jnp.allclose(logits2, ref2, atol=3e-2, rtol=3e-2), (
        float(jnp.max(jnp.abs(logits2 - ref2))))

    print("KERNEL_OK")
</pallas_src>

<mosaic_0001>
module attributes {stable_mosaic.version = 11 : i64} {
  func.func @_clip_adapter_single_step_kernel(%arg0: memref<16x1024xbf16, #tpu.memory_space<vmem>>, %arg1: memref<1024x128xbf16, #tpu.memory_space<vmem>>, %arg2: memref<1x128xf32, #tpu.memory_space<vmem>>, %arg3: memref<128x128xbf16, #tpu.memory_space<vmem>>, %arg4: memref<16x128xf32, #tpu.memory_space<vmem>>) attributes {dimension_semantics = [], scalar_prefetch = 0 : i64, scratch_operands = 0 : i64, tpu.core_type = #tpu.core_type<tc>} {
    %c0 = arith.constant 0 : index
    %c0_0 = arith.constant 0 : index
    %0 = vector.load %arg0[%c0, %c0_0] : memref<16x1024xbf16, #tpu.memory_space<vmem>>, vector<16x1024xbf16>
    %c0_1 = arith.constant 0 : index
    %c0_2 = arith.constant 0 : index
    %1 = vector.load %arg1[%c0_1, %c0_2] : memref<1024x128xbf16, #tpu.memory_space<vmem>>, vector<1024x128xbf16>
    %cst = arith.constant dense<0.000000e+00> : vector<16x128xf32>
    %2 = tpu.matmul %0, %1, %cst {dimension_numbers = #tpu.dot_dimension_numbers<[1], [0], [0], [1], [0, 0, 1, 1], [], []>} : vector<16x1024xbf16>, vector<1024x128xbf16>, vector<16x128xf32> -> vector<16x128xf32>
    %c0_3 = arith.constant 0 : index
    %c0_4 = arith.constant 0 : index
    %3 = vector.load %arg2[%c0_3, %c0_4] : memref<1x128xf32, #tpu.memory_space<vmem>>, vector<1x128xf32>
    %4 = vector.broadcast %3 : vector<1x128xf32> to vector<16x128xf32>
    %5 = arith.addf %2, %4 : vector<16x128xf32>
    %6 = arith.mulf %5, %5 : vector<16x128xf32>
    %cst_5 = arith.constant dense<0.000000e+00> : vector<16xf32>
    %7 = vector.multi_reduction <add>, %6, %cst_5 [1] : vector<16x128xf32> to vector<16xf32>
    %8 = vector.shape_cast %7 : vector<16xf32> to vector<16x1xf32>
    %cst_6 = arith.constant 0.000000e+00 : f32
    %9 = vector.broadcast %cst_6 : f32 to vector<16x1xf32>
    %10 = arith.cmpf ogt, %8, %9 : vector<16x1xf32>
    %11 = math.rsqrt %8 : vector<16x1xf32>
    %cst_7 = arith.constant 1.000000e+02 : f32
    %12 = vector.broadcast %cst_7 : f32 to vector<16x1xf32>
    %13 = arith.mulf %12, %11 : vector<16x1xf32>
    %cst_8 = arith.constant 0.000000e+00 : f32
    %14 = vector.broadcast %cst_8 : f32 to vector<16x1xf32>
    %15 = arith.select %10, %13, %14 : vector<16x1xi1>, vector<16x1xf32>
    %16 = arith.truncf %5 : vector<16x128xf32> to vector<16x128xbf16>
    %c0_9 = arith.constant 0 : index
    %c0_10 = arith.constant 0 : index
    %17 = vector.load %arg3[%c0_9, %c0_10] : memref<128x128xbf16, #tpu.memory_space<vmem>>, vector<128x128xbf16>
    %cst_11 = arith.constant dense<0.000000e+00> : vector<16x128xf32>
    %18 = tpu.matmul %16, %17, %cst_11 {dimension_numbers = #tpu.dot_dimension_numbers<[1], [0], [0], [1], [0, 0, 1, 1], [], []>} : vector<16x128xbf16>, vector<128x128xbf16>, vector<16x128xf32> -> vector<16x128xf32>
    %19 = vector.broadcast %15 : vector<16x1xf32> to vector<16x128xf32>
    %20 = arith.mulf %18, %19 : vector<16x128xf32>
    %c0_12 = arith.constant 0 : index
    %c0_13 = arith.constant 0 : index
    %21 = vector.load %arg4[%c0_12, %c0_13] : memref<16x128xf32, #tpu.memory_space<vmem>>, vector<16x128xf32>
    tpu.vector_store %arg4[%c0_12, %c0_13], %20 {strides = array<i32>} : memref<16x128xf32, #tpu.memory_space<vmem>>, vector<16x128xf32>,
    return
  }
}

</mosaic_0001>

<bundles_post_ra>
// kernel: tpu_custom_call.1
= control target key start
LH: loop header
LB: loop body
LE: loop exit
PB: predicated region body
PF: predicated region fallthrough
CT: control target
= control target key end

     0   :  { %9 = vsyncpa [#allocation3], 0  ;;  %s1443_s0 = inlined_call_operand.hbm [shape: bf16[16,1024], index: 0, kind: input, shape index: {}]   ;;  %s1444_s1 = inlined_call_operand.hbm [shape: bf16[1024,128], index: 1, kind: input, shape index: {}]   ;;  %s1445_s2 = inlined_call_operand.vmem [shape: f32[1,128], index: 2, kind: input, shape index: {}]   ;;  %s1446_s3 = inlined_call_operand.hbm [shape: bf16[128,128], index: 3, kind: input, shape index: {}]   ;;  %s1447_s4 = inlined_call_operand.hbm [shape: f32[16,128], index: 4, kind: output, shape index: {}]  }
   0x1   :  { %10 = vsyncpa [#allocation6], 0  ;;  %s29_s17 = sshll.u32 %s1444_s1, 4  ;;  %s30_s17 = int_to_ptr.hbm [resolvable:$true] %s29_s17 }
   0x2   :  { %11 = vsyncpa [#allocation4], 0  ;;  %s1393_s18 = smov [#allocation5]   ;;  %s16_s22 = sshll.u32 %s1443_s0, 4  ;;  %s17_s22 = int_to_ptr.hbm [resolvable:$true] %s16_s22 }
   0x3   :  { %s31_s19 = sshll.u32 %s1393_s18, 4  ;;  %s1394_s23 = smov 64   ;;  %s32_s19 = int_to_ptr.vmem [resolvable:$true] %s31_s19 }
   0x4   :  { %s1395_s24 = smov 4   ;;  %s1396_s25 = smov [#allocation2]  }
   0x5   :  { %37 = dma.hbm_to_vmem [thread:$0]  %s30_s17, 8192, %s32_s19, [#allocation6], %s1394_s23, %s1394_s23, %s1395_s24  }
   0x6   :  { %s18_s26 = sshll.u32 %s1396_s25, 4  ;;  %s1397_s27 = smov 512   ;;  %s19_s26 = int_to_ptr.vmem [resolvable:$true] %s18_s26 }
   0x7   :  { %s1398_s28 = smov 32   ;;  %s44_s30 = sshll.u32 %s1446_s3, 4  ;;  %s45_s30 = int_to_ptr.hbm [resolvable:$true] %s44_s30 }
   0x8   :  { %24 = dma.hbm_to_vmem [thread:$0]  %s17_s22, 1024, %s19_s26, [#allocation3], %s1397_s27, %s1397_s27, %s1398_s28  }
   0x9   :  { %s1399_s5 = smov [#allocation7]  }
   0xa   :  { %s46_s6 = sshll.u32 %s1399_s5, 4  ;;  %s47_s6 = int_to_ptr.vmem [resolvable:$true] %s46_s6 }
   0xb   :  { %52 = dma.hbm_to_vmem [thread:$0]  %s45_s30, 1024, %s47_s6, [#allocation6], %s1394_s23, %s1394_s23, %s1395_s24  }
   0xc   :  { %1387 = dma.done.wait [#allocation3], 1024  }
   0xd   :  { %1388 = vsyncadd [#allocation3], 4294966272 }
   0xe   :  { %1389 = dma.done.wait [#allocation6], 9216  }
   0xf   :  { %1390 = vsyncadd [#allocation6], 4294958080  ;;  %v1211_v0 = vld [vmem:[#allocation5 + $0x38] sm:$0xff]  ;;  %v1210_v4 = vld [vmem:[#allocation5 + $0x30] sm:$0xff]  ;;  %s862_s10 = sshll.u32 %s1447_s4, 4  ;;  %s1401_s11 = smov 128   ;;  %s863_s10 = int_to_ptr.hbm [resolvable:$true] %s862_s10 }
  0x10   :  { %v1219_v1 = vld [vmem:[#allocation5 + $0x78] sm:$0xff]  ;;  %629 = vmatpush.bf16.msra.mxu0 %v1211_v0  ;;  %v1218_v5 = vld [vmem:[#allocation5 + $0x70] sm:$0xff]  ;;  %v1209_v8 = vld [vmem:[#allocation5 + $0x28] sm:$0xff]  ;;  %s1402_s12 = smov 8  }
  0x11   :  { %v1227_v2 = vld [vmem:[#allocation5 + $0xb8] sm:$0xff]  ;;  %643 = vmatpush.bf16.msra.mxu1 %v1219_v1  ;;  %v1226_v6 = vld [vmem:[#allocation5 + $0xb0] sm:$0xff]  ;;  %v1217_v9 = vld [vmem:[#allocation5 + $0x68] sm:$0xff] }
  0x12   :  { %v1235_v3 = vld [vmem:[#allocation5 + $0xf8] sm:$0xff]  ;;  %657 = vmatpush.bf16.msra.mxu2 %v1227_v2  ;;  %v1234_v7 = vld [vmem:[#allocation5 + $0xf0] sm:$0xff]  ;;  %v1225_v10 = vld [vmem:[#allocation5 + $0xa8] sm:$0xff] }
  0x13   :  { %671 = vmatpush.bf16.msra.mxu3 %v1235_v3  ;;  %v1233_v11 = vld [vmem:[#allocation5 + $0xe8] sm:$0xff]  ;;  %v1208_v12 = vld [vmem:[#allocation5 + $0x20] sm:$0xff]  ;;  %v1207_v16 = vld [vmem:[#allocation5 + $0x18] sm:$0xff] }
  0x14   :  { %630 = vmatpush.bf16.msra.mxu0 %v1210_v4  ;;  %v1216_v13 = vld [vmem:[#allocation5 + $0x60] sm:$0xff]  ;;  %v1215_v17 = vld [vmem:[#allocation5 + $0x58] sm:$0xff]  ;;  %v1206_v20 = vld [vmem:[#allocation5 + $0x10] sm:$0xff] }
  0x15   :  { %644 = vmatpush.bf16.msra.mxu1 %v1218_v5  ;;  %v1224_v14 = vld [vmem:[#allocation5 + $0xa0] sm:$0xff]  ;;  %v1223_v18 = vld [vmem:[#allocation5 + $0x98] sm:$0xff]  ;;  %v1214_v21 = vld [vmem:[#allocation5 + $0x50] sm:$0xff] }
  0x16   :  { %658 = vmatpush.bf16.msra.mxu2 %v1226_v6  ;;  %v1232_v15 = vld [vmem:[#allocation5 + $0xe0] sm:$0xff]  ;;  %v1231_v19 = vld [vmem:[#allocation5 + $0xd8] sm:$0xff]  ;;  %v1222_v22 = vld [vmem:[#allocation5 + $0x90] sm:$0xff] }
  0x17   :  { %672 = vmatpush.bf16.msra.mxu3 %v1234_v7  ;;  %v1230_v23 = vld [vmem:[#allocation5 + $0xd0] sm:$0xff]  ;;  %v1205_v24 = vld [vmem:[#allocation5 + $0x8] sm:$0xff]  ;;  %v1204_v28 = vld [vmem:[#allocation5] sm:$0xff] }
  0x18   :  { %631 = vmatpush.bf16.msra.mxu0 %v1209_v8  ;;  %v1213_v25 = vld [vmem:[#allocation5 + $0x48] sm:$0xff]  ;;  %v1212_v29 = vld [vmem:[#allocation5 + $0x40] sm:$0xff]  ;;  %v1243_v32 = vld [vmem:[#allocation5 + $0x138] sm:$0xff] }
  0x19   :  { %645 = vmatpush.bf16.msra.mxu1 %v1217_v9  ;;  %v1221_v26 = vld [vmem:[#allocation5 + $0x88] sm:$0xff]  ;;  %v1220_v30 = vld [vmem:[#allocation5 + $0x80] sm:$0xff]  ;;  %v1251_v33 = vld [vmem:[#allocation5 + $0x178] sm:$0xff] }
  0x1a   :  { %659 = vmatpush.bf16.msra.mxu2 %v1225_v10  ;;  %v1229_v27 = vld [vmem:[#allocation5 + $0xc8] sm:$0xff]  ;;  %v1228_v31 = vld [vmem:[#allocation5 + $0xc0] sm:$0xff]  ;;  %v1259_v42 = vld [vmem:[#allocation5 + $0x1b8] sm:$0xff] }
  0x1b   :  { %673 = vmatpush.bf16.msra.mxu3 %v1233_v11  ;;  %v886_v34 = vld [vmem:[#allocation2 + $0x8] sm:$0xf]  ;;  %v878_v36 = vld [vmem:[#allocation2] sm:$0xf]  ;;  %v1197_v38 = vld [vmem:[#allocation2 + $0xc] sm:$0xf] }
  0x1c   :  { %632 = vmatpush.bf16.msra.mxu0 %v1208_v12  ;;  %v1201_v35 = vld [vmem:[#allocation2 + $0x24] sm:$0xf0]  ;;  %v1200_v37 = vld [vmem:[#allocation2 + $0x1c] sm:$0xf0]  ;;  %v888_v39 = vld [vmem:[#allocation2 + $0x28] sm:$0xf0] }
  0x1d   :  { %646 = vmatpush.bf16.msra.mxu1 %v1216_v13  ;;  %v1196_v40 = vld [vmem:[#allocation2 + $0x4] sm:$0xf]  ;;  %v1267_v43 = vld [vmem:[#allocation5 + $0x1f8] sm:$0xff]  ;;  %v887_v44 = vor.u32 %v1201_v35, %v886_v34  ;;  %v879_v45 = vor.u32 %v1200_v37, %v878_v36  ;;  %v891_v46 = vor.u32 %v1197_v38, %v888_v39  ;;  %v1242_v48 = vld [vmem:[#allocation5 + $0x130] sm:$0xff] }
  0x1e   :  { %660 = vmatpush.bf16.msra.mxu2 %v1224_v14  ;;  %v880_v41 = vld [vmem:[#allocation2 + $0x20] sm:$0xf0]  ;;  %v1250_v49 = vld [vmem:[#allocation5 + $0x170] sm:$0xff]  ;;  %v1241_v52 = vld [vmem:[#allocation5 + $0x128] sm:$0xff] }
  0x1f   :  { %674 = vmatpush.bf16.msra.mxu3 %v1232_v15  ;;  %v883_v47 = vor.u32 %v1196_v40, %v880_v41  ;;  %v1258_v50 = vld [vmem:[#allocation5 + $0x1b0] sm:$0xff]  ;;  %v1249_v53 = vld [vmem:[#allocation5 + $0x168] sm:$0xff]  ;;  %v1240_v56 = vld [vmem:[#allocation5 + $0x120] sm:$0xff] }
  0x20   :  { %633 = vmatpush.bf16.msra.mxu0 %v1207_v16  ;;  %v1266_v51 = vld [vmem:[#allocation5 + $0x1f0] sm:$0xff]  ;;  %v1257_v54 = vld [vmem:[#allocation5 + $0x1a8] sm:$0xff]  ;;  %v1248_v57 = vld [vmem:[#allocation5 + $0x160] sm:$0xff] }
  0x21   :  { %647 = vmatpush.bf16.msra.mxu1 %v1215_v17  ;;  %v1265_v55 = vld [vmem:[#allocation5 + $0x1e8] sm:$0xff]  ;;  %v1256_v58 = vld [vmem:[#allocation5 + $0x1a0] sm:$0xff]  ;;  %v1239_v60 = vld [vmem:[#allocation5 + $0x118] sm:$0xff] }
  0x22   :  { %661 = vmatpush.bf16.msra.mxu2 %v1223_v18  ;;  %v1264_v59 = vld [vmem:[#allocation5 + $0x1e0] sm:$0xff]  ;;  %v1247_v61 = vld [vmem:[#allocation5 + $0x158] sm:$0xff]  ;;  %v1238_v0 = vld [vmem:[#allocation5 + $0x110] sm:$0xff] }
  0x23   :  { %675 = vmatpush.bf16.msra.mxu3 %v1231_v19  ;;  %v1255_v62 = vld [vmem:[#allocation5 + $0x198] sm:$0xff]  ;;  %v1246_v1 = vld [vmem:[#allocation5 + $0x150] sm:$0xff]  ;;  %v1237_v4 = vld [vmem:[#allocation5 + $0x108] sm:$0xff] }
  0x24   :  { %634 = vmatpush.bf16.msra.mxu0 %v1206_v20  ;;  %v1263_v63 = vld [vmem:[#allocation5 + $0x1d8] sm:$0xff]  ;;  %v1254_v2 = vld [vmem:[#allocation5 + $0x190] sm:$0xff]  ;;  %v1245_v5 = vld [vmem:[#allocation5 + $0x148] sm:$0xff] }
  0x25   :  { %648 = vmatpush.bf16.msra.mxu1 %v1214_v21  ;;  %v1262_v3 = vld [vmem:[#allocation5 + $0x1d0] sm:$0xff]  ;;  %v1253_v6 = vld [vmem:[#allocation5 + $0x188] sm:$0xff]  ;;  %v1236_v8 = vld [vmem:[#allocation5 + $0x100] sm:$0xff] }
  0x26   :  { %662 = vmatpush.bf16.msra.mxu2 %v1222_v22  ;;  %v1261_v7 = vld [vmem:[#allocation5 + $0x1c8] sm:$0xff]  ;;  %v1244_v9 = vld [vmem:[#allocation5 + $0x140] sm:$0xff]  ;;  %v894_v12 = vld [vmem:[#allocation2 + $0x10] sm:$0xf] }
  0x27   :  { %676 = vmatpush.bf16.msra.mxu3 %v1230_v23  ;;  %v1252_v10 = vld [vmem:[#allocation5 + $0x180] sm:$0xff]  ;;  %v1202_v13 = vld [vmem:[#allocation2 + $0x2c] sm:$0xf0]  ;;  %v1198_v14 = vld [vmem:[#allocation2 + $0x14] sm:$0xf] }
  0x28   :  { %635 = vmatpush.bf16.msra.mxu0 %v1205_v24  ;;  %v1260_v11 = vld [vmem:[#allocation5 + $0x1c0] sm:$0xff]  ;;  %v896_v15 = vld [vmem:[#allocation2 + $0x30] sm:$0xf0]  ;;  %v902_v16 = vld [vmem:[#allocation2 + $0x18] sm:$0xf]  ;;  %v895_v20 = vor.u32 %v1202_v13, %v894_v12 }
  0x29   :  { %649 = vmatpush.bf16.msra.mxu1 %v1213_v25  ;;  %v1203_v17 = vld [vmem:[#allocation2 + $0x34] sm:$0xf0]  ;;  %v1199_v18 = vld [vmem:[#allocation2 + $0x1c] sm:$0xf]  ;;  %v899_v21 = vor.u32 %v1198_v14, %v896_v15  ;;  %v1274_v25 = vld [vmem:[#allocation7 + $0x30] sm:$0xff] }
  0x2a   :  { %663 = vmatpush.bf16.msra.mxu2 %v1221_v26  ;;  %v904_v19 = vld [vmem:[#allocation2 + $0x38] sm:$0xf0]  ;;  %v903_v22 = vor.u32 %v1203_v17, %v902_v16  ;;  %v1273_v26 = vld [vmem:[#allocation7 + $0x28] sm:$0xff]  ;;  %v1268_v34 = vld [vmem:[#allocation7] sm:$0xff] }
  0x2b   :  { %677 = vmatpush.bf16.msra.mxu3 %v1229_v27  ;;  %v907_v23 = vor.u32 %v1199_v18, %v904_v19  ;;  %v1275_v24 = vld [vmem:[#allocation7 + $0x38] sm:$0xff]  ;;  %v1272_v27 = vld [vmem:[#allocation7 + $0x20] sm:$0xff] }
  0x2c   :  { %636 = vmatpush.bf16.msra.mxu0 %v1204_v28  ;;  %v1271_v28 = vld [vmem:[#allocation7 + $0x18] sm:$0xff] }
  0x2d   :  { %650 = vmatpush.bf16.msra.mxu1 %v1212_v29  ;;  %v1270_v29 = vld [vmem:[#allocation7 + $0x10] sm:$0xff] }
  0x2e   :  { %664 = vmatpush.bf16.msra.mxu2 %v1220_v30  ;;  %v1269_v30 = vld [vmem:[#allocation7 + $0x8] sm:$0xff] }
  0x2f   :  { %678 = vmatpush.bf16.msra.mxu3 %v1228_v31  ;;  %637 = vmatmul.bf16.vlgmr.msra.gmra.mxu0 %v879_v45 }
  0x30   :  { %685 = vmatpush.bf16.msrb.mxu0 %v1243_v32  ;;  %651 = vmatmul.bf16.vlgmr.msra.gmra.mxu1 %v883_v47  ;;  %v1286_v32 = vld [vmem:[%s1445_s2] ss:$0 sm:$0xff]  ;;  %s1400_s2 = smov [#allocation8]  }
  0x31   :  { %699 = vmatpush.bf16.msrb.mxu1 %v1251_v33  ;;  %665 = vmatmul.bf16.vlgmr.msra.gmra.mxu2 %v887_v44  ;;  %s860_s7 = sshll.u32 %s1400_s2, 4  ;;  %s861_s7 = int_to_ptr.vmem [resolvable:$true] %s860_s7 }
  0x32   :  { %713 = vmatpush.bf16.msrb.mxu2 %v1259_v42  ;;  %679 = vmatmul.bf16.vlgmr.msra.gmra.mxu3 %v891_v46 }
  0x33   :  { %727 = vmatpush.bf16.msrb.mxu3 %v1267_v43 }
  0x34   :  { %686 = vmatpush.bf16.msrb.mxu0 %v1242_v48 }
  0x35   :  { %700 = vmatpush.bf16.msrb.mxu1 %v1250_v49 }
  0x36   :  { %714 = vmatpush.bf16.msrb.mxu2 %v1258_v50 }
  0x37   :  { %728 = vmatpush.bf16.msrb.mxu3 %v1266_v51 }
  0x38   :  { %687 = vmatpush.bf16.msrb.mxu0 %v1241_v52 }
  0x39   :  { %701 = vmatpush.bf16.msrb.mxu1 %v1249_v53 }
  0x3a   :  { %715 = vmatpush.bf16.msrb.mxu2 %v1257_v54 }
  0x3b   :  { %729 = vmatpush.bf16.msrb.mxu3 %v1265_v55 }
  0x3c   :  { %688 = vmatpush.bf16.msrb.mxu0 %v1240_v56 }
  0x3d   :  { %702 = vmatpush.bf16.msrb.mxu1 %v1248_v57 }
  0x3e   :  { %716 = vmatpush.bf16.msrb.mxu2 %v1256_v58 }
  0x3f   :  { %730 = vmatpush.bf16.msrb.mxu3 %v1264_v59 }
  0x40   :  { %689 = vmatpush.bf16.msrb.mxu0 %v1239_v60 }
  0x41   :  { %703 = vmatpush.bf16.msrb.mxu1 %v1247_v61 }
  0x42   :  { %717 = vmatpush.bf16.msrb.mxu2 %v1255_v62 }
  0x43   :  { %731 = vmatpush.bf16.msrb.mxu3 %v1263_v63 }
  0x44   :  { %690 = vmatpush.bf16.msrb.mxu0 %v1238_v0 }
  0x45   :  { %704 = vmatpush.bf16.msrb.mxu1 %v1246_v1 }
  0x46   :  { %718 = vmatpush.bf16.msrb.mxu2 %v1254_v2 }
  0x47   :  { %732 = vmatpush.bf16.msrb.mxu3 %v1262_v3 }
  0x48   :  { %691 = vmatpush.bf16.msrb.mxu0 %v1237_v4 }
  0x49   :  { %705 = vmatpush.bf16.msrb.mxu1 %v1245_v5 }
  0x4a   :  { %719 = vmatpush.bf16.msrb.mxu2 %v1253_v6 }
  0x4b   :  { %733 = vmatpush.bf16.msrb.mxu3 %v1261_v7 }
  0x4c   :  { %692 = vmatpush.bf16.msrb.mxu0 %v1236_v8 }
  0x4d   :  { %706 = vmatpush.bf16.msrb.mxu1 %v1244_v9 }
  0x4e   :  { %720 = vmatpush.bf16.msrb.mxu2 %v1252_v10 }
  0x4f   :  { %734 = vmatpush.bf16.msrb.mxu3 %v1260_v11  ;;  %693 = vmatmul.bf16.vlgmr.msrb.gmra.mxu0 %v895_v20 }
  0x50   :  { %707 = vmatmul.bf16.vlgmr.msrb.gmra.mxu1 %v899_v21  ;;  %838 = vmatpush.bf16.msra.mxu0 %v1275_v24 }
  0x51   :  { %721 = vmatmul.bf16.vlgmr.msrb.gmra.mxu2 %v903_v22 }
  0x52   :  { %735 = vmatmul.bf16.vlgmr.msrb.gmra.mxu3 %v907_v23 }
  0x54   :  { %839 = vmatpush.bf16.msra.mxu0 %v1274_v25 }
  0x58   :  { %840 = vmatpush.bf16.msra.mxu0 %v1273_v26 }
  0x5c   :  { %841 = vmatpush.bf16.msra.mxu0 %v1272_v27 }
  0x60   :  { %842 = vmatpush.bf16.msra.mxu0 %v1271_v28 }
  0x64   :  { %843 = vmatpush.bf16.msra.mxu0 %v1270_v29 }
  0x68   :  { %844 = vmatpush.bf16.msra.mxu0 %v1269_v30 }
  0x6c   :  { %845 = vmatpush.bf16.msra.mxu0 %v1268_v34 }
  0xac   :  { %v638_v31 = vpop.f32.mrf.mxu0 }
  0xad   :  { %v652_v33 = vpop.f32.mrf.mxu1  ;;  %v639_v35 = vadd.f32 %v1286_v32, %v638_v31 }
  0xaf   :  { %v653_v38 = vadd.f32 %v652_v33, %v639_v35 }
  0xb4   :  { %v666_v36 = vpop.f32.mrf.mxu2  ;;  %v640_v39 = vpop.f32.mrf.mxu0 }
  0xb5   :  { %v680_v37 = vpop.f32.mrf.mxu3  ;;  %v654_v40 = vpop.f32.mrf.mxu1  ;;  %v667_v41 = vadd.f32 %v666_v36, %v653_v38  ;;  %v641_v42 = vadd.f32 %v1286_v32, %v640_v39 }
  0xb7   :  { %v681_v45 = vadd.f32 %v680_v37, %v667_v41  ;;  %v655_v46 = vadd.f32 %v654_v40, %v641_v42 }
  0xbc   :  { %v668_v43 = vpop.f32.mrf.mxu2 }
  0xbd   :  { %v682_v44 = vpop.f32.mrf.mxu3  ;;  %v669_v50 = vadd.f32 %v668_v43, %v655_v46 }
  0xbf   :  { %v683_v54 = vadd.f32 %v682_v44, %v669_v50 }
  0xcc   :  { %v694_v47 = vpop.f32.mrf.mxu0 }
  0xcd   :  { %v695_v48 = vadd.f32 %v694_v47, %v681_v45  ;;  %v708_v49 = vpop.f32.mrf.mxu1 }
  0xcf   :  { %v709_v51 = vadd.f32 %v708_v49, %v695_v48 }
  0xd4   :  { %v722_v52 = vpop.f32.mrf.mxu2  ;;  %v696_v56 = vpop.f32.mrf.mxu0 }
  0xd5   :  { %v736_v53 = vpop.f32.mrf.mxu3  ;;  %v723_v55 = vadd.f32 %v722_v52, %v709_v51  ;;  %v697_v58 = vadd.f32 %v696_v56, %v683_v54  ;;  %v710_v60 = vpop.f32.mrf.mxu1 }
  0xd7   :  { %v737_v57 = vadd.f32 %v736_v53, %v723_v55  ;;  %v711_v61 = vadd.f32 %v710_v60, %v697_v58 }
  0xd9   :  { %v741_v59 = vmul.f32 %v737_v57, %v737_v57 }
  0xdb   :  { %743 = vadd.xlane.f32.xlu0 %v741_v59 }
  0xdc   :  { %v724_v62 = vpop.f32.mrf.mxu2 }
  0xdd   :  { %v725_v63 = vadd.f32 %v724_v62, %v711_v61  ;;  %v738_v0 = vpop.f32.mrf.mxu3 }
  0xdf   :  { %v739_v1 = vadd.f32 %v738_v0, %v725_v63 }
  0xe1   :  { %v773_v2 = vpack.c.bf16 %v739_v1, %v737_v57  ;;  %v742_v3 = vmul.f32 %v739_v1, %v739_v1 }
  0xe3   :  { %846 = vmatmul.bf16.vlgmr.msra.gmra.mxu0 %v773_v2  ;;  %745 = vadd.xlane.f32.xlu0 %v742_v3 }
 0x14e   :  { %v744_v4 = vpop.xlane.xlu0 %743 }
 0x14f   :  { %1287 = vrsqrt.f32 %v744_v4  ;;  %vm755_vm1 = vweird.f32 %v744_v4  ;;  %vm747_vm3 = vcmp.gt.f32.partialorder %v744_v4, 0.0 }
 0x155   :  { %v1288_v5 = vpop.eup %1287 }
 0x156   :  { %v750_v6 = vmul.f32 %v1288_v5, %v744_v4  ;;  %v746_v7 = vpop.xlane.xlu0 %745  ;;  %vm756_vm0 = vweird.f32 %v1288_v5 }
 0x157   :  { %1289 = vrsqrt.f32 %v746_v7  ;;  %vm757_vm2 = vmor %vm755_vm1, %vm756_vm0  ;;  %vm765_vm5 = vweird.f32 %v746_v7  ;;  %vm748_vm7 = vcmp.gt.f32.partialorder %v746_v7, 0.0 }
 0x158   :  { %v751_v8 = vmul.f32 %v1288_v5, %v750_v6 }
 0x15a   :  { %v752_v9 = vmul.f32 0.5, %v751_v8 }
 0x15c   :  { %v753_v10 = vsub.f32 1.5, %v752_v9 }
 0x15d   :  { %v1290_v11 = vpop.eup %1289 }
 0x15e   :  { %v760_v12 = vmul.f32 %v1290_v11, %v746_v7  ;;  %v754_v13 = vmul.f32 %v1288_v5, %v753_v10  ;;  %vm766_vm4 = vweird.f32 %v1290_v11 }
 0x15f   :  { %vm767_vm6 = vmor %vm765_vm5, %vm766_vm4 }
 0x160   :  { %v761_v14 = vmul.f32 %v1290_v11, %v760_v12  ;;  %v758_v15 = vsel %vm757_vm2, %v1288_v5, %v754_v13  ;;  %v847_v17 = vpop.f32.mrf.mxu0 }
 0x161   :  { %v769_v16 = vmul.f32 100.0, %v758_v15 }
 0x162   :  { %v762_v18 = vmul.f32 0.5, %v761_v14 }
 0x163   :  { %v771_v19 = vsel %vm747_vm3, %v769_v16, 0.0 }
 0x164   :  { %v763_v20 = vsub.f32 1.5, %v762_v18  ;;  %v852_v21 = vmul.f32 %v847_v17, %v771_v19 }
 0x166   :  { %854 = vst [vmem:[#allocation8] sm:$0xff] %v852_v21  ;;  %v764_v22 = vmul.f32 %v1290_v11, %v763_v20 }
 0x168   :  { %v768_v23 = vsel %vm767_vm6, %v1290_v11, %v764_v22  ;;  %v849_v26 = vpop.f32.mrf.mxu0 }
 0x169   :  { %v770_v24 = vmul.f32 100.0, %v768_v23 }
 0x16b   :  { %v772_v25 = vsel %vm748_vm7, %v770_v24, 0.0 }
 0x16c   :  { %v853_v27 = vmul.f32 %v849_v26, %v772_v25 }
 0x16e   :  { %855 = vst [vmem:[#allocation8 + $0x8] sm:$0xff] %v853_v27 }
 0x16f   :  { %868 = dma.vmem_to_hbm [thread:$0]  %s861_s7, 256, %s863_s10, [#allocation4], %s1401_s11, %s1401_s11, %s1402_s12  }
 0x170   :  { %1391 = dma.done.wait [#allocation4], 256  }
 0x171   :  { %1392 = vsyncadd [#allocation4], 4294967040 }
 0x172   :  { %873 = vsyncpa [#allocation3], 1 }
 0x173   :  { %874 = vsyncpa [#allocation6], 1 }
 0x174   :  { %875 = vsyncpa [#allocation4], 1 }

</bundles_post_ra>
